<compile_context>
chip_gen: v7x
topology: tpu7x:2x2x1
jax: 0.10.0
libtpu: 0.0.40
codegen_flags: <defaults>
</compile_context>

<pallas_src>
import functools

import jax
import jax.numpy as jnp
from jax.experimental import pallas as pl
from jax.experimental.pallas import tpu as pltpu

LANE = 128          # TPU vreg lane width (informational)
SUBLANE = 16        # bf16 sublane packing granularity
TILE_M = 2048       # row tile target (multiple of SUBLANE); a few MiB of VMEM


def _round_up(v, m):
    return ((v + m - 1) // m) * m


def _choose_tile_m(M):
    """Pick the row-tile size and padded row count.

    Goals: multiple of SUBLANE, <= TILE_M, divides the aligned row count when
    possible (so the final row crop disappears), and yields >= 2 grid tiles
    whenever M permits so both v7x TensorCores get work."""
    m_aligned = _round_up(max(M, 1), SUBLANE)
    # target: at least 2 tiles (v7x megacore), each at most TILE_M rows
    tile = min(TILE_M, _round_up((m_aligned + 1) // 2, SUBLANE))
    tile = max(tile, SUBLANE)
    # prefer an exact divisor of the aligned row count (no padded tail rows),
    # but only if it keeps tiles reasonably large (grid-step overhead).
    best = None
    for cand in range(tile, SUBLANE - 1, -SUBLANE):
        if m_aligned % cand == 0:
            best = cand
            break
    if best is not None and best * 2 >= tile:
        tile = best
    m_pad = _round_up(m_aligned, tile)
    return tile, m_pad


# ----------------------------------------------------------------------------
# Pallas kernel: fused matmul + bias + activation (hot path of every layer)
# ----------------------------------------------------------------------------
def _matmul_bias_act_kernel(x_ref, w_ref, b_ref, o_ref, *, act):
    acc = jnp.dot(x_ref[...], w_ref[...], preferred_element_type=jnp.float32)
    acc = acc + b_ref[...]                       # bias broadcast over rows (f32)
    if act == "relu":
        acc = jnp.maximum(acc, 0.0)
    elif act == "sigmoid":
        # numerically-stable logistic; exp / reciprocal go to the EUP slot.
        z = jnp.exp(-jnp.abs(acc))
        num = jnp.where(acc >= 0.0, 1.0, z)
        acc = num * pl.reciprocal(1.0 + z, approx=False)   # exact: stays in [0,1]
    o_ref[...] = acc.astype(o_ref.dtype)


def matmul_bias_act(x, w, b, act, out_dtype=jnp.float32):
    """act((M,K) @ (K,N) + b) -> (M,N) in `out_dtype`.

    MXU inputs are cast to bf16; K is padded to the bf16 sublane granularity
    only when needed; N is left at its true width (block spans the full dim,
    masked stores beat 2-10x padded write amplification on this mem-bound
    workload); M is tiled with a parallel grid axis (>=2 tiles when possible
    for v7x megacore)."""
    M, K = x.shape
    N = w.shape[1]

    tile_m, M_pad = _choose_tile_m(M)
    K_pad = _round_up(K, SUBLANE)

    x_p = x
    if (M_pad, K_pad) != (M, K):
        x_p = jnp.pad(x, ((0, M_pad - M), (0, K_pad - K)))
    x_p = x_p.astype(jnp.bfloat16)

    w_p = w if K_pad == K else jnp.pad(w, ((0, K_pad - K), (0, 0)))
    w_p = w_p.astype(jnp.bfloat16)
    b_p = b.reshape(1, N).astype(jnp.float32)

    y = pl.pallas_call(
        functools.partial(_matmul_bias_act_kernel, act=act),
        out_shape=jax.ShapeDtypeStruct((M_pad, N), out_dtype),
        grid=(M_pad // tile_m,),
        in_specs=[
            pl.BlockSpec((tile_m, K_pad), lambda i: (i, 0)),   # row tile
            pl.BlockSpec((K_pad, N), lambda i: (0, 0)),        # resident weight
            pl.BlockSpec((1, N), lambda i: (0, 0)),            # resident bias
        ],
        out_specs=pl.BlockSpec((tile_m, N), lambda i: (i, 0)),
        compiler_params=pltpu.CompilerParams(
            dimension_semantics=("parallel",),          # M tiles are independent
            vmem_limit_bytes=32 * 1024 * 1024,          # safe on v5e/v6e/v7x
        ),
    )(x_p, w_p, b_p)
    return y if M_pad == M else y[:M]


# ----------------------------------------------------------------------------
# JAX glue: patch extraction (pure slicing / reshape, no heavy compute)
# ----------------------------------------------------------------------------
def _im2col(x_nhwc, k, stride, pad):
    """x: (N,H,W,C) -> patches (N*Ho*Wo, k*k*C), plus (Ho, Wo)."""
    # TODO(synk): fuse patch extraction into the Pallas kernel (halo'd spatial
    # tiles DMA'd once + 9 accumulated shifted matmuls) to remove the
    # ~2.25x-inflated patch-matrix round trip through HBM; that is the
    # remaining dominant byte stream at large batch/resolution.
    x = jnp.pad(x_nhwc, ((0, 0), (pad, pad), (pad, pad), (0, 0)))
    n, h, w, c = x.shape
    ho = (h - k) // stride + 1
    wo = (w - k) // stride + 1
    cols = []
    for di in range(k):
        for dj in range(k):
            cols.append(x[:, di:di + stride * ho:stride,
                          dj:dj + stride * wo:stride, :])
    p = jnp.stack(cols, axis=3)                    # (N, Ho, Wo, k*k, C)
    return p.reshape(n * ho * wo, k * k * c), ho, wo


# ----------------------------------------------------------------------------
# Layers (semantics identical to the PyTorch modules)
# ----------------------------------------------------------------------------
def conv2d(x_nhwc, w_oihw, b, *, stride, pad, act, out_dtype):
    """nn.Conv2d: weight (Cout, Cin, kH, kW)."""
    cout, cin, k, _ = w_oihw.shape
    patches, ho, wo = _im2col(x_nhwc, k, stride, pad)
    # column order in patches is (kh, kw, cin); match it in the weight matrix.
    w_mat = jnp.transpose(w_oihw, (2, 3, 1, 0)).reshape(k * k * cin, cout)
    y = matmul_bias_act(patches, w_mat, b, act, out_dtype=out_dtype)
    return y.reshape(x_nhwc.shape[0], ho, wo, cout)


def _subpixel_deconv_weight(w_iohw):
    """ConvTranspose2d weight (Cin,Cout,3,3) -> (4*Cin, 4*Cout) sub-pixel weight
    for stride=2, padding=1, output_padding=1.

    Rows: 2x2 input neighborhood (dy, dx, ci). Cols: 2x2 output phase (ry, rx, co).
    Output row oy=2m+ry draws on input row m (dy=0) and, for ry=1, row m+1 (dy=1):
      ry=0: dy=0 -> ky=1,  dy=1 -> no contribution
      ry=1: dy=0 -> ky=2,  dy=1 -> ky=0          (same mapping for columns)."""
    cin, cout, _, _ = w_iohw.shape
    w = jnp.transpose(w_iohw, (2, 3, 0, 1))        # (ky, kx, Cin, Cout)
    zeros = jnp.zeros((cin, cout), w.dtype)

    def tap(ry, rx, dy, dx):
        ky = (1 if dy == 0 else None) if ry == 0 else (2 if dy == 0 else 0)
        kx = (1 if dx == 0 else None) if rx == 0 else (2 if dx == 0 else 0)
        if ky is None or kx is None:
            return zeros
        return w[ky, kx]

    rows = []
    for dy in range(2):
        for dx in range(2):
            rows.append(jnp.concatenate(
                [tap(ry, rx, dy, dx) for ry in range(2) for rx in range(2)],
                axis=1))                           # (Cin, 4*Cout)
    return jnp.concatenate(rows, axis=0)           # (4*Cin, 4*Cout)


def conv_transpose2d_s2(x_nhwc, w_iohw, b, *, act, out_dtype):
    """nn.ConvTranspose2d(k=3, stride=2, padding=1, output_padding=1) via the
    sub-pixel (4-phase) decomposition: one dense matmul, no zero-stuffing."""
    n, h, w_sp, cin = x_nhwc.shape
    cout = w_iohw.shape[1]
    # 2x2 input neighborhood patches (one zero row/col appended bottom/right).
    xp = jnp.pad(x_nhwc, ((0, 0), (0, 1), (0, 1), (0, 0)))
    p = jnp.stack([xp[:, dy:dy + h, dx:dx + w_sp, :]
                   for dy in range(2) for dx in range(2)], axis=3)
    patches = p.reshape(n * h * w_sp, 4 * cin)            # (M, 4*Cin)
    w_mat = _subpixel_deconv_weight(w_iohw)               # (4*Cin, 4*Cout)
    b4 = jnp.tile(b, 4)                                   # (ry, rx, co) order
    y = matmul_bias_act(patches, w_mat, b4, act, out_dtype=out_dtype)  # (M, 4*Cout)
    y = y.reshape(n, h, w_sp, 2, 2, cout)
    y = jnp.transpose(y, (0, 1, 3, 2, 4, 5))              # (N, H, ry, W, rx, Co)
    return y.reshape(n, 2 * h, 2 * w_sp, cout)            # depth-to-space


# ----------------------------------------------------------------------------
# Autoencoder forward pass
# ----------------------------------------------------------------------------
def init_params(key):
    """Deterministic synthetic parameters (shapes match the PyTorch module)."""
    def uinit(k, shape, fan_in):
        bound = 1.0 / jnp.sqrt(fan_in)
        return jax.random.uniform(k, shape, jnp.float32, -bound, bound)

    ks = jax.random.split(key, 8)
    return {
        # encoder: Conv2d weights are (Cout, Cin, kH, kW)
        "w1": uinit(ks[0], (32, 3, 3, 3), 3 * 9),    "b1": uinit(ks[1], (32,), 3 * 9),
        "w2": uinit(ks[2], (64, 32, 3, 3), 32 * 9),  "b2": uinit(ks[3], (64,), 32 * 9),
        # decoder: ConvTranspose2d weights are (Cin, Cout, kH, kW)
        "w3": uinit(ks[4], (64, 32, 3, 3), 64 * 9),  "b3": uinit(ks[5], (32,), 64 * 9),
        "w4": uinit(ks[6], (32, 3, 3, 3), 32 * 9),   "b4": uinit(ks[7], (3,), 32 * 9),
    }


@jax.jit
def autoencoder_forward(x_nchw, params):
    # NCHW -> NHWC; cast once to bf16 (layer 1's MXU inputs are bf16 anyway,
    # so this halves the first patch-matrix HBM stream).
    x = jnp.transpose(x_nchw, (0, 2, 3, 1)).astype(jnp.bfloat16)
    # encoder (bf16 intermediates: mem-bound pipeline, f32 stores are wasted bytes)
    x = conv2d(x, params["w1"], params["b1"], stride=2, pad=1, act="relu",
               out_dtype=jnp.bfloat16)
    x = conv2d(x, params["w2"], params["b2"], stride=2, pad=1, act="relu",
               out_dtype=jnp.bfloat16)
    # decoder
    x = conv_transpose2d_s2(x, params["w3"], params["b3"], act="relu",
                            out_dtype=jnp.bfloat16)
    x = conv_transpose2d_s2(x, params["w4"], params["b4"], act="sigmoid",
                            out_dtype=jnp.float32)         # final layer stays f32
    return jnp.transpose(x, (0, 3, 1, 2))                  # NHWC -> NCHW


if __name__ == "__main__":
    key = jax.random.PRNGKey(0)
    k_x, k_p = jax.random.split(key)
    # small RGB input, batch=2, 16x16 spatial (NCHW, matching PyTorch)
    x = jax.random.uniform(k_x, (2, 3, 16, 16), jnp.float32)
    params = init_params(k_p)

    y = autoencoder_forward(x, params)
    jax.block_until_ready(y)

    assert y.shape == (2, 3, 16, 16), y.shape
    assert y.dtype == jnp.float32
    assert bool(jnp.all(jnp.isfinite(y)))
    assert bool(jnp.all((y >= 0.0) & (y <= 1.0)))   # sigmoid output range
    print("KERNEL_OK")
</pallas_src>

<mosaic_0001>
module attributes {stable_mosaic.version = 11 : i64} {
  func.func @_matmul_bias_act_kernel(%arg0: i32, %arg1: memref<64x32xbf16, #tpu.memory_space<vmem>>, %arg2: memref<32x32xbf16, #tpu.memory_space<vmem>>, %arg3: memref<1x32xf32, #tpu.memory_space<vmem>>, %arg4: memref<64x32xbf16, #tpu.memory_space<vmem>>) attributes {dimension_semantics = [#tpu.dimension_semantics<parallel>], iteration_bounds = array<i64: 2>, scalar_prefetch = 0 : i64, scratch_operands = 0 : i64, tpu.core_type = #tpu.core_type<tc>, window_params = [{transform_indices = @transform_0, window_bounds = array<i64: 64, 32>}, {pipeline_mode = #tpu.pipeline_mode<synchronous>, transform_indices = @transform_1, window_bounds = array<i64: 32, 32>}, {pipeline_mode = #tpu.pipeline_mode<synchronous>, transform_indices = @transform_2, window_bounds = array<i64: 1, 32>}, {transform_indices = @transform_3, window_bounds = array<i64: 64, 32>}]} {
    %c0 = arith.constant 0 : index
    %c0_0 = arith.constant 0 : index
    %0 = vector.load %arg1[%c0, %c0_0] : memref<64x32xbf16, #tpu.memory_space<vmem>>, vector<64x32xbf16>
    %c0_1 = arith.constant 0 : index
    %c0_2 = arith.constant 0 : index
    %1 = vector.load %arg2[%c0_1, %c0_2] : memref<32x32xbf16, #tpu.memory_space<vmem>>, vector<32x32xbf16>
    %cst = arith.constant dense<0.000000e+00> : vector<64x32xf32>
    %2 = tpu.matmul %0, %1, %cst {dimension_numbers = #tpu.dot_dimension_numbers<[1], [0], [0], [1], [0, 0, 1, 1], [], []>} : vector<64x32xbf16>, vector<32x32xbf16>, vector<64x32xf32> -> vector<64x32xf32>
    %c0_3 = arith.constant 0 : index
    %c0_4 = arith.constant 0 : index
    %3 = vector.load %arg3[%c0_3, %c0_4] : memref<1x32xf32, #tpu.memory_space<vmem>>, vector<1x32xf32>
    %4 = vector.broadcast %3 : vector<1x32xf32> to vector<64x32xf32>
    %5 = arith.addf %2, %4 : vector<64x32xf32>
    %cst_5 = arith.constant 0.000000e+00 : f32
    %6 = vector.broadcast %cst_5 : f32 to vector<64x32xf32>
    %7 = arith.maximumf %5, %6 : vector<64x32xf32>
    %8 = arith.truncf %7 : vector<64x32xf32> to vector<64x32xbf16>
    %c0_6 = arith.constant 0 : index
    %c0_7 = arith.constant 0 : index
    %9 = vector.load %arg4[%c0_6, %c0_7] : memref<64x32xbf16, #tpu.memory_space<vmem>>, vector<64x32xbf16>
    tpu.vector_store %arg4[%c0_6, %c0_7], %8 {strides = array<i32>} : memref<64x32xbf16, #tpu.memory_space<vmem>>, vector<64x32xbf16>,
    return
  }
  func.func @transform_0(%arg0: i32) -> (i32, i32) {
    %c0_i32 = arith.constant 0 : i32
    %c0_i32_0 = arith.constant 0 : i32
    return %arg0, %c0_i32 : i32, i32
  }
  func.func @transform_1(%arg0: i32) -> (i32, i32) {
    %c0_i32 = arith.constant 0 : i32
    %c0_i32_0 = arith.constant 0 : i32
    %c0_i32_1 = arith.constant 0 : i32
    return %c0_i32, %c0_i32_0 : i32, i32
  }
  func.func @transform_2(%arg0: i32) -> (i32, i32) {
    %c0_i32 = arith.constant 0 : i32
    %c0_i32_0 = arith.constant 0 : i32
    %c0_i32_1 = arith.constant 0 : i32
    return %c0_i32, %c0_i32_0 : i32, i32
  }
  func.func @transform_3(%arg0: i32) -> (i32, i32) {
    %c0_i32 = arith.constant 0 : i32
    %c0_i32_0 = arith.constant 0 : i32
    return %arg0, %c0_i32 : i32, i32
  }
}

module attributes {stable_mosaic.version = 11 : i64} {
  func.func @_matmul_bias_act_kernel(%arg0: i32, %arg1: memref<16x288xbf16, #tpu.memory_space<vmem>>, %arg2: memref<288x64xbf16, #tpu.memory_space<vmem>>, %arg3: memref<1x64xf32, #tpu.memory_space<vmem>>, %arg4: memref<16x64xbf16, #tpu.memory_space<vmem>>) attributes {dimension_semantics = [#tpu.dimension_semantics<parallel>], iteration_bounds = array<i64: 2>, scalar_prefetch = 0 : i64, scratch_operands = 0 : i64, tpu.core_type = #tpu.core_type<tc>, window_params = [{transform_indices = @transform_0, window_bounds = array<i64: 16, 288>}, {pipeline_mode = #tpu.pipeline_mode<synchronous>, transform_indices = @transform_1, window_bounds = array<i64: 288, 64>}, {pipeline_mode = #tpu.pipeline_mode<synchronous>, transform_indices = @transform_2, window_bounds = array<i64: 1, 64>}, {transform_indices = @transform_3, window_bounds = array<i64: 16, 64>}]} {
    %c0 = arith.constant 0 : index
    %c0_0 = arith.constant 0 : index
    %0 = vector.load %arg1[%c0, %c0_0] : memref<16x288xbf16, #tpu.memory_space<vmem>>, vector<16x288xbf16>
    %c0_1 = arith.constant 0 : index
    %c0_2 = arith.constant 0 : index
    %1 = vector.load %arg2[%c0_1, %c0_2] : memref<288x64xbf16, #tpu.memory_space<vmem>>, vector<288x64xbf16>
    %cst = arith.constant dense<0.000000e+00> : vector<16x64xf32>
    %2 = tpu.matmul %0, %1, %cst {dimension_numbers = #tpu.dot_dimension_numbers<[1], [0], [0], [1], [0, 0, 1, 1], [], []>} : vector<16x288xbf16>, vector<288x64xbf16>, vector<16x64xf32> -> vector<16x64xf32>
    %c0_3 = arith.constant 0 : index
    %c0_4 = arith.constant 0 : index
    %3 = vector.load %arg3[%c0_3, %c0_4] : memref<1x64xf32, #tpu.memory_space<vmem>>, vector<1x64xf32>
    %4 = vector.broadcast %3 : vector<1x64xf32> to vector<16x64xf32>
    %5 = arith.addf %2, %4 : vector<16x64xf32>
    %cst_5 = arith.constant 0.000000e+00 : f32
    %6 = vector.broadcast %cst_5 : f32 to vector<16x64xf32>
    %7 = arith.maximumf %5, %6 : vector<16x64xf32>
    %8 = arith.truncf %7 : vector<16x64xf32> to vector<16x64xbf16>
    %c0_6 = arith.constant 0 : index
    %c0_7 = arith.constant 0 : index
    %9 = vector.load %arg4[%c0_6, %c0_7] : memref<16x64xbf16, #tpu.memory_space<vmem>>, vector<16x64xbf16>
    tpu.vector_store %arg4[%c0_6, %c0_7], %8 {strides = array<i32>} : memref<16x64xbf16, #tpu.memory_space<vmem>>, vector<16x64xbf16>,
    return
  }
  func.func @transform_0(%arg0: i32) -> (i32, i32) {
    %c0_i32 = arith.constant 0 : i32
    %c0_i32_0 = arith.constant 0 : i32
    return %arg0, %c0_i32 : i32, i32
  }
  func.func @transform_1(%arg0: i32) -> (i32, i32) {
    %c0_i32 = arith.constant 0 : i32
    %c0_i32_0 = arith.constant 0 : i32
    %c0_i32_1 = arith.constant 0 : i32
    return %c0_i32, %c0_i32_0 : i32, i32
  }
  func.func @transform_2(%arg0: i32) -> (i32, i32) {
    %c0_i32 = arith.constant 0 : i32
    %c0_i32_0 = arith.constant 0 : i32
    %c0_i32_1 = arith.constant 0 : i32
    return %c0_i32, %c0_i32_0 : i32, i32
  }
  func.func @transform_3(%arg0: i32) -> (i32, i32) {
    %c0_i32 = arith.constant 0 : i32
    %c0_i32_0 = arith.constant 0 : i32
    return %arg0, %c0_i32 : i32, i32
  }
}

module attributes {stable_mosaic.version = 11 : i64} {
  func.func @_matmul_bias_act_kernel(%arg0: i32, %arg1: memref<16x256xbf16, #tpu.memory_space<vmem>>, %arg2: memref<256x128xbf16, #tpu.memory_space<vmem>>, %arg3: memref<1x128xf32, #tpu.memory_space<vmem>>, %arg4: memref<16x128xbf16, #tpu.memory_space<vmem>>) attributes {dimension_semantics = [#tpu.dimension_semantics<parallel>], iteration_bounds = array<i64: 2>, scalar_prefetch = 0 : i64, scratch_operands = 0 : i64, tpu.core_type = #tpu.core_type<tc>, window_params = [{transform_indices = @transform_0, window_bounds = array<i64: 16, 256>}, {pipeline_mode = #tpu.pipeline_mode<synchronous>, transform_indices = @transform_1, window_bounds = array<i64: 256, 128>}, {pipeline_mode = #tpu.pipeline_mode<synchronous>, transform_indices = @transform_2, window_bounds = array<i64: 1, 128>}, {transform_indices = @transform_3, window_bounds = array<i64: 16, 128>}]} {
    %c0 = arith.constant 0 : index
    %c0_0 = arith.constant 0 : index
    %0 = vector.load %arg1[%c0, %c0_0] : memref<16x256xbf16, #tpu.memory_space<vmem>>, vector<16x256xbf16>
    %c0_1 = arith.constant 0 : index
    %c0_2 = arith.constant 0 : index
    %1 = vector.load %arg2[%c0_1, %c0_2] : memref<256x128xbf16, #tpu.memory_space<vmem>>, vector<256x128xbf16>
    %cst = arith.constant dense<0.000000e+00> : vector<16x128xf32>
    %2 = tpu.matmul %0, %1, %cst {dimension_numbers = #tpu.dot_dimension_numbers<[1], [0], [0], [1], [0, 0, 1, 1], [], []>} : vector<16x256xbf16>, vector<256x128xbf16>, vector<16x128xf32> -> vector<16x128xf32>
    %c0_3 = arith.constant 0 : index
    %c0_4 = arith.constant 0 : index
    %3 = vector.load %arg3[%c0_3, %c0_4] : memref<1x128xf32, #tpu.memory_space<vmem>>, vector<1x128xf32>
    %4 = vector.broadcast %3 : vector<1x128xf32> to vector<16x128xf32>
    %5 = arith.addf %2, %4 : vector<16x128xf32>
    %cst_5 = arith.constant 0.000000e+00 : f32
    %6 = vector.broadcast %cst_5 : f32 to vector<16x128xf32>
    %7 = arith.maximumf %5, %6 : vector<16x128xf32>
    %8 = arith.truncf %7 : vector<16x128xf32> to vector<16x128xbf16>
    %c0_6 = arith.constant 0 : index
    %c0_7 = arith.constant 0 : index
    %9 = vector.load %arg4[%c0_6, %c0_7] : memref<16x128xbf16, #tpu.memory_space<vmem>>, vector<16x128xbf16>
    tpu.vector_store %arg4[%c0_6, %c0_7], %8 {strides = array<i32>} : memref<16x128xbf16, #tpu.memory_space<vmem>>, vector<16x128xbf16>,
    return
  }
  func.func @transform_0(%arg0: i32) -> (i32, i32) {
    %c0_i32 = arith.constant 0 : i32
    %c0_i32_0 = arith.constant 0 : i32
    return %arg0, %c0_i32 : i32, i32
  }
  func.func @transform_1(%arg0: i32) -> (i32, i32) {
    %c0_i32 = arith.constant 0 : i32
    %c0_i32_0 = arith.constant 0 : i32
    %c0_i32_1 = arith.constant 0 : i32
    return %c0_i32, %c0_i32_0 : i32, i32
  }
  func.func @transform_2(%arg0: i32) -> (i32, i32) {
    %c0_i32 = arith.constant 0 : i32
    %c0_i32_0 = arith.constant 0 : i32
    %c0_i32_1 = arith.constant 0 : i32
    return %c0_i32, %c0_i32_0 : i32, i32
  }
  func.func @transform_3(%arg0: i32) -> (i32, i32) {
    %c0_i32 = arith.constant 0 : i32
    %c0_i32_0 = arith.constant 0 : i32
    return %arg0, %c0_i32 : i32, i32
  }
}

module attributes {stable_mosaic.version = 11 : i64} {
  func.func @_matmul_bias_act_kernel(%arg0: i32, %arg1: memref<64x128xbf16, #tpu.memory_space<vmem>>, %arg2: memref<128x12xbf16, #tpu.memory_space<vmem>>, %arg3: memref<1x12xf32, #tpu.memory_space<vmem>>, %arg4: memref<64x12xf32, #tpu.memory_space<vmem>>) attributes {dimension_semantics = [#tpu.dimension_semantics<parallel>], iteration_bounds = array<i64: 2>, scalar_prefetch = 0 : i64, scratch_operands = 0 : i64, tpu.core_type = #tpu.core_type<tc>, window_params = [{transform_indices = @transform_0, window_bounds = array<i64: 64, 128>}, {pipeline_mode = #tpu.pipeline_mode<synchronous>, transform_indices = @transform_1, window_bounds = array<i64: 128, 12>}, {pipeline_mode = #tpu.pipeline_mode<synchronous>, transform_indices = @transform_2, window_bounds = array<i64: 1, 12>}, {transform_indices = @transform_3, window_bounds = array<i64: 64, 12>}]} {
    %c0 = arith.constant 0 : index
    %c0_0 = arith.constant 0 : index
    %0 = vector.load %arg1[%c0, %c0_0] : memref<64x128xbf16, #tpu.memory_space<vmem>>, vector<64x128xbf16>
    %c0_1 = arith.constant 0 : index
    %c0_2 = arith.constant 0 : index
    %1 = vector.load %arg2[%c0_1, %c0_2] : memref<128x12xbf16, #tpu.memory_space<vmem>>, vector<128x12xbf16>
    %cst = arith.constant dense<0.000000e+00> : vector<64x12xf32>
    %2 = tpu.matmul %0, %1, %cst {dimension_numbers = #tpu.dot_dimension_numbers<[1], [0], [0], [1], [0, 0, 1, 1], [], []>} : vector<64x128xbf16>, vector<128x12xbf16>, vector<64x12xf32> -> vector<64x12xf32>
    %c0_3 = arith.constant 0 : index
    %c0_4 = arith.constant 0 : index
    %3 = vector.load %arg3[%c0_3, %c0_4] : memref<1x12xf32, #tpu.memory_space<vmem>>, vector<1x12xf32>
    %4 = vector.broadcast %3 : vector<1x12xf32> to vector<64x12xf32>
    %5 = arith.addf %2, %4 : vector<64x12xf32>
    %6 = math.absf %5 : vector<64x12xf32>
    %cst_5 = arith.constant 0.000000e+00 : f32
    %7 = vector.broadcast %cst_5 : f32 to vector<64x12xf32>
    %8 = arith.subf %7, %6 : vector<64x12xf32>
    %9 = math.exp %8 : vector<64x12xf32>
    %cst_6 = arith.constant 0.000000e+00 : f32
    %10 = vector.broadcast %cst_6 : f32 to vector<64x12xf32>
    %11 = arith.cmpf oge, %5, %10 : vector<64x12xf32>
    %cst_7 = arith.constant 1.000000e+00 : f32
    %12 = vector.broadcast %cst_7 : f32 to vector<64x12xf32>
    %13 = arith.select %11, %12, %9 : vector<64x12xi1>, vector<64x12xf32>
    %cst_8 = arith.constant 1.000000e+00 : f32
    %14 = vector.broadcast %cst_8 : f32 to vector<64x12xf32>
    %15 = arith.addf %14, %9 : vector<64x12xf32>
    %16 = tpu.reciprocal %15 : vector<64x12xf32> -> vector<64x12xf32>
    %17 = arith.mulf %13, %16 : vector<64x12xf32>
    %c0_9 = arith.constant 0 : index
    %c0_10 = arith.constant 0 : index
    %18 = vector.load %arg4[%c0_9, %c0_10] : memref<64x12xf32, #tpu.memory_space<vmem>>, vector<64x12xf32>
    tpu.vector_store %arg4[%c0_9, %c0_10], %17 {strides = array<i32>} : memref<64x12xf32, #tpu.memory_space<vmem>>, vector<64x12xf32>,
    return
  }
  func.func @transform_0(%arg0: i32) -> (i32, i32) {
    %c0_i32 = arith.constant 0 : i32
    %c0_i32_0 = arith.constant 0 : i32
    return %arg0, %c0_i32 : i32, i32
  }
  func.func @transform_1(%arg0: i32) -> (i32, i32) {
    %c0_i32 = arith.constant 0 : i32
    %c0_i32_0 = arith.constant 0 : i32
    %c0_i32_1 = arith.constant 0 : i32
    return %c0_i32, %c0_i32_0 : i32, i32
  }
  func.func @transform_2(%arg0: i32) -> (i32, i32) {
    %c0_i32 = arith.constant 0 : i32
    %c0_i32_0 = arith.constant 0 : i32
    %c0_i32_1 = arith.constant 0 : i32
    return %c0_i32, %c0_i32_0 : i32, i32
  }
  func.func @transform_3(%arg0: i32) -> (i32, i32) {
    %c0_i32 = arith.constant 0 : i32
    %c0_i32_0 = arith.constant 0 : i32
    return %arg0, %c0_i32 : i32, i32
  }
}

</mosaic_0001>

<bundles_post_ra>
// kernel: autoencoder_forward.4
= control target key start
LH: loop header
LB: loop body
LE: loop exit
PB: predicated region body
PF: predicated region fallthrough
CT: control target
= control target key end

     0   :  { %s511_s12 = smov 0   ;;  %s548_s0 = inlined_call_operand.vmem [shape: bf16[128,32], index: 0, kind: input, shape index: {}]   ;;  %s549_s1 = inlined_call_operand.vmem [shape: bf16[32,32], index: 1, kind: input, shape index: {}]   ;;  %s550_s2 = inlined_call_operand.vmem [shape: f32[1,32], index: 2, kind: input, shape index: {}]   ;;  %s551_s3 = inlined_call_operand.vmem [shape: bf16[128,32], index: 3, kind: output, shape index: {}]  }
   0x1 LB: > { %s409_s13 = sadd.s32 4294967295, %s489_s12   ;;  %p413_p0 = scmp.ge.s32.totalorder %s489_s12, 1  ;;  %s489_s12 = sphi %s511_s12, %s13_s12  }
   0x2   : > { %p138_p1 = scmp.lt.s32.totalorder %s489_s12, 3 }
   0x4   : > { %p139_p2 = pnand %p413_p0, %p138_p1 }
   0x5   : > { %v477_v0 = vld [vmem:[%s549_s1] sm:$0xff] (!%p139_p2)   ;;  %s414_s16 = sshll.u32 (!%p139_p2), %s409_s13, 3  ;;  %v478_v1 = vld [vmem:[%s549_s1 + $0x8] sm:$0xff] (!%p139_p2)   ;;  %vm226_vm0 = vcmask (!%p139_p2), 261120   ;;  %vm344_vm1 = vcmask (!%p139_p2), 257024  }
   0x6   : > { %142 = sbr.rel (%p139_p2) target bundleno = 240 (0xf0), region = 32  ;;  %p163_p3 = scmp.lt.s32.totalorder (!%p139_p2), %s414_s16, 15  ;;  %453 = vmatprep.subr.bf16.mxu0 (!%p139_p2), %v477_v0  ;;  %465 = vmatprep.subr.bf16.mxu1 (!%p139_p2), %v477_v0  ;;  %v418_v6 = vld [vmem:[%s550_s2] ss:$0 sm:$0xff] (!%p139_p2) }
   0x7   : > { %454 = vmatpush3.bf16.msra.mxu0 (!%p139_p2), %v477_v0  ;;  %467 = vmatpush3.bf16.msra.mxu1 (!%p139_p2), %v477_v0 }
   0x8   : > { %455 = vmatprep.subr.bf16.mxu0 (!%p139_p2), %v478_v1  ;;  %466 = vmatprep.subr.bf16.mxu1 (!%p139_p2), %v478_v1 }
   0xb   : > { %456 = vmatpush3.bf16.msra.mxu0 (!%p139_p2), %v478_v1  ;;  %468 = vmatpush3.bf16.msra.mxu1 (!%p139_p2), %v478_v1 }
   0xd   : > { %s553_s16 = smov (!%p163_p3, %s414_s16), 15 }
   0xe   : > { %s415_s19 = sshll.u32 %s553_s16, 2 }
   0xf   : > { %s166_s22 = scalar_lea.vmem %s548_s0, %s415_s19  ;;  %s172_s27 = scalar_lea.vmem %s551_s3, %s415_s19 }
  0x10   : > { %v479_v2 = vld [vmem:[%s166_s22] sm:$0xff]   ;;  %v480_v3 = vld [vmem:[%s166_s22 + $0x10] sm:$0xff]   ;;  %v481_v4 = vld [vmem:[%s166_s22 + $0x8] sm:$0xff]  }
  0x11   : > { %457 = vmatprep.mubr.msk.bf16.mxu0 %vm226_vm0, %v479_v2  ;;  %461 = vmatprep.mubr.msk.bf16.mxu1 %vm226_vm0, %v480_v3  ;;  %v482_v5 = vld [vmem:[%s166_s22 + $0x18] sm:$0xff]  }
  0x12   : > { %458 = vmatmul.mubr.msk.bf16.vlgmr.msra.gmra.mrb[0].mxu0 %vm226_vm0, %v481_v4  ;;  %462 = vmatmul.mubr.msk.bf16.vlgmr.msra.gmra.mrb[0].mxu1 %vm226_vm0, %v482_v5 }
  0xe5   : > { %v459_v7 = vpop.f32.mrb[0].mxu0  ;;  %v463_v9 = vpop.f32.mrb[0].mxu1 }
  0xe6   : > { %v282_v8 = vadd.f32 %v459_v7, %v418_v6  ;;  %v273_v10 = vpop.f32.mrb[1].mxu0  ;;  %v298_v11 = vadd.f32 %v463_v9, %v418_v6  ;;  %v289_v13 = vpop.f32.mrb[1].mxu1 }
  0xe7   : > { %v274_v12 = vadd.f32 %v418_v6, %v273_v10  ;;  %v460_v14 = vpop.f32.mrb[2].mxu0  ;;  %v290_v16 = vadd.f32 %v418_v6, %v289_v13  ;;  %v464_v18 = vpop.f32.mrb[2].mxu1 }
  0xe8   : > { %v306_v15 = vmax.f32 %v282_v8, 0.0  ;;  %v285_v17 = vadd.f32 %v460_v14, %v418_v6  ;;  %v276_v19 = vpop.f32.mrb[3].mxu0  ;;  %v310_v20 = vmax.f32 %v298_v11, 0.0  ;;  %v301_v22 = vadd.f32 %v464_v18, %v418_v6  ;;  %v292_v24 = vpop.f32.mrb[3].mxu1 }
  0xe9   : > { %v304_v21 = vmax.f32 %v274_v12, 0.0  ;;  %v277_v23 = vadd.f32 %v418_v6, %v276_v19  ;;  %v308_v26 = vmax.f32 %v290_v16, 0.0  ;;  %v293_v28 = vadd.f32 %v418_v6, %v292_v24 }
  0xea   : > { %v441_v25 = vpack.c.bf16 %v306_v15, %v306_v15  ;;  %v307_v27 = vmax.f32 %v285_v17, 0.0  ;;  %v445_v29 = vpack.c.bf16 %v310_v20, %v310_v20  ;;  %v311_v31 = vmax.f32 %v301_v22, 0.0 }
  0xeb   : > { %v439_v30 = vpack.c.bf16 %v304_v21, %v304_v21  ;;  %v305_v32 = vmax.f32 %v277_v23, 0.0  ;;  %v443_v33 = vpack.c.bf16 %v308_v26, %v308_v26  ;;  %v309_v35 = vmax.f32 %v293_v28, 0.0 }
  0xec   : > { %347 = vst.msk [vmem:[%s172_s27 + $0x8] sm:$0xf] %vm344_vm1, %v441_v25  ;;  %v442_v34 = vpack.c.bf16 %v307_v27, %v307_v27  ;;  %351 = vst.msk [vmem:[%s172_s27 + $0x18] sm:$0xf] %vm344_vm1, %v445_v29  ;;  %v446_v36 = vpack.c.bf16 %v311_v31, %v311_v31 }
  0xed   : > { %345 = vst.msk [vmem:[%s172_s27] sm:$0xf] %vm344_vm1, %v439_v30  ;;  %v440_v37 = vpack.c.bf16 %v305_v32, %v305_v32  ;;  %349 = vst.msk [vmem:[%s172_s27 + $0x10] sm:$0xf] %vm344_vm1, %v443_v33  ;;  %v444_v38 = vpack.c.bf16 %v309_v35, %v309_v35 }
  0xee   : > { %348 = vst.msk [vmem:[%s172_s27 + $0xc] sm:$0xf] %vm344_vm1, %v442_v34  ;;  %352 = vst.msk [vmem:[%s172_s27 + $0x1c] sm:$0xf] %vm344_vm1, %v446_v36 }
  0xef   : > { %346 = vst.msk [vmem:[%s172_s27 + $0x4] sm:$0xf] %vm344_vm1, %v440_v37  ;;  %350 = vst.msk [vmem:[%s172_s27 + $0x14] sm:$0xf] %vm344_vm1, %v444_v38 }
  0xf0 PF: > { %s13_s12 = sadd.s32 1, %s489_s12  }
  0xf1   : > { %p10_p4 = scmp.ge.s32.totalorder %s13_s12, 4  }
  0xf3   :  { %12 = sbr.rel (!%p10_p4) target bundleno = 1 (0x1), region = 62 }

// kernel: tile.13
= control target key start
LH: loop header
LB: loop body
LE: loop exit
PB: predicated region body
PF: predicated region fallthrough
CT: control target
= control target key end

     0   :  { %s22_s0 = inlined_call_operand.vmem [shape: f32[32], index: 0, kind: input, shape index: {}]   ;;  %s23_s1 = inlined_call_operand.vmem [shape: f32[4,32], index: 1, kind: output, shape index: {}]  }
   0x1   :  { %v4_v0 = vld [vmem:[%s22_s0] ss:$0 sm:$0xff] }
   0x2   :  { %5 = vst [vmem:[%s23_s1] sm:$0xf] %v4_v0 }

// kernel: tile.14
= control target key start
LH: loop header
LB: loop body
LE: loop exit
PB: predicated region body
PF: predicated region fallthrough
CT: control target
= control target key end

     0   :  { %vm7_vm0 = vcmask 261120   ;;  %s37_s8 = smov 32   ;;  %s38_s9 = smov 64   ;;  %vm13_vm1 = vcmask 1048320   ;;  %vm19_vm2 = vcmask 785920   ;;  %vm25_vm3 = vcmask 523520   ;;  %s55_s0 = inlined_call_operand.vmem [shape: f32[4,32], index: 0, kind: input, shape index: {}]   ;;  %s56_s1 = inlined_call_operand.vmem [shape: f32[1,128], index: 1, kind: output, shape index: {}]  }
   0x1   :  { %v4_v0 = vld [vmem:[%s55_s0] sm:$0xf]  ;;  %s36_s0 = smov 96  }
   0x2   :  { %5 = vst [vmem:[#allocation1] sm:$0xf] %v4_v0 }
   0x9   :  { %v10_v1 = vld [vmem:[#allocation1 + $0x3] sm:$0x1]   ;;  %v22_v2 = vld [vmem:[#allocation1 + $0x1] sm:$0x1]   ;;  %v6_v3 = vld [vmem:[#allocation1] sm:$0x1]  }
   0xa   :  { %11 = vrot.lane.b32.xlu0 %v10_v1, %s36_s0  ;;  %23 = vrot.lane.b32.xlu1 %v22_v2, %s37_s8  ;;  %v16_v4 = vld [vmem:[#allocation1 + $0x2] sm:$0x1]   ;;  %8 = vst.msk [vmem:[#allocation0] sm:$0x1] %vm7_vm0, %v6_v3  }
   0xe   :  { %17 = vrot.lane.b32.xlu0 %v16_v4, %s38_s9 }
  0x7c   :  { %v12_v5 = vpop.permute.xlu0 %11   ;;  %v24_v6 = vpop.permute.xlu1 %23  }
  0x7d   :  { %14 = vst.msk [vmem:[#allocation0] sm:$0x1] %vm13_vm1, %v12_v5  }
  0x80   :  { %v18_v7 = vpop.permute.xlu0 %17  }
  0x81   :  { %20 = vst.msk [vmem:[#allocation0] sm:$0x1] %vm19_vm2, %v18_v7  }
  0x82   :  { %26 = vst.msk [vmem:[#allocation0] sm:$0x1] %vm25_vm3, %v24_v6  }
  0x89   :  { %v30_v8 = vld [vmem:[#allocation0] sm:$0x1] }
  0x8a   :  { %32 = vst [vmem:[%s56_s1] sm:$0x1] %v30_v8 }

// kernel: autoencoder_forward.5
= control target key start
LH: loop header
LB: loop body
LE: loop exit
PB: predicated region body
PF: predicated region fallthrough
CT: control target
= control target key end

     0   :  { %s637_s12 = smov 0   ;;  %s715_s0 = inlined_call_operand.vmem [shape: bf16[32,288], index: 0, kind: input, shape index: {}]   ;;  %s716_s1 = inlined_call_operand.vmem [shape: bf16[288,64], index: 1, kind: input, shape index: {}]   ;;  %s717_s2 = inlined_call_operand.vmem [shape: f32[1,64], index: 2, kind: input, shape index: {}]   ;;  %s718_s3 = inlined_call_operand.vmem [shape: bf16[32,64], index: 3, kind: output, shape index: {}]  }
   0x1 LB: > { %s503_s13 = sadd.s32 4294967295, %s613_s12   ;;  %p507_p0 = scmp.ge.s32.totalorder %s613_s12, 1  ;;  %s613_s12 = sphi %s637_s12, %s13_s12  }
   0x2   : > { %p139_p1 = scmp.lt.s32.totalorder %s613_s12, 3 }
   0x4   : > { %p140_p2 = pnand %p507_p0, %p139_p1 }
   0x5   : > { %v585_v0 = vld [vmem:[%s716_s1 + $0x40] sm:$0xff] (!%p140_p2)   ;;  %v615_v2 = vmov (!%p140_p2), 0.0   ;;  %s508_s18 = sshll.u32 (!%p140_p2), %s503_s13, 1  ;;  %v587_v3 = vld [vmem:[%s716_s1 + $0x48] sm:$0xff] (!%p140_p2)   ;;  %v589_v5 = vld [vmem:[%s716_s1 + $0x50] sm:$0xff] (!%p140_p2)   ;;  %vm616_vm0 = vmmov (!%p140_p2), 0  }
   0x6   : > { %143 = sbr.rel (%p140_p2) target bundleno = 264 (0x108), region = 32  ;;  %v586_v1 = vld [vmem:[%s716_s1] sm:$0xff] (!%p140_p2)   ;;  %566 = vmatprep.subr.bf16.mxu1 (!%p140_p2), %v615_v2  ;;  %541 = vmatprep.subr.bf16.mxu0 (!%p140_p2), %v585_v0  ;;  %p165_p3 = scmp.lt.s32.totalorder (!%p140_p2), %s508_s18, 3  ;;  %v588_v4 = vld [vmem:[%s716_s1 + $0x8] sm:$0xff] (!%p140_p2)   ;;  %v590_v6 = vld [vmem:[%s716_s1 + $0x10] sm:$0xff] (!%p140_p2)   ;;  %vm348_vm1 = vcmask (!%p140_p2), 261120  }
   0x7   : > { %542 = vmatpush3.bf16.msra.mxu0 (!%p140_p2), %v586_v1  ;;  %570 = vmatprep.mubr.msk.bf16.mxu1 (!%p140_p2), %vm616_vm0, %v615_v2  ;;  %v591_v7 = vld [vmem:[%s716_s1 + $0x58] sm:$0xff] (!%p140_p2)   ;;  %v593_v9 = vld [vmem:[%s716_s1 + $0x60] sm:$0xff] (!%p140_p2)   ;;  %v595_v12 = vld [vmem:[%s716_s1 + $0x68] sm:$0xff] (!%p140_p2)   ;;  %vm444_vm2 = vcmask (!%p140_p2), 519168  }
   0x8   : > { %543 = vmatprep.subr.bf16.mxu0 (!%p140_p2), %v587_v3  ;;  %v592_v8 = vld [vmem:[%s716_s1 + $0x18] sm:$0xff] (!%p140_p2)   ;;  %v599_v10 = vld [vmem:[%s716_s1 + $0x80] sm:$0xff] (!%p140_p2)   ;;  %v596_v13 = vld [vmem:[%s716_s1 + $0x28] sm:$0xff] (!%p140_p2)  }
   0x9   : > { %v594_v11 = vld [vmem:[%s716_s1 + $0x20] sm:$0xff] (!%p140_p2)   ;;  %567 = vmatpush3.bf16.msra.mxu1 (!%p140_p2), %v599_v10  ;;  %v605_v15 = vld [vmem:[%s716_s1 + $0x88] sm:$0xff] (!%p140_p2)   ;;  %v597_v16 = vld [vmem:[%s716_s1 + $0x70] sm:$0xff] (!%p140_p2)  }
   0xa   : > { %568 = vmatprep.subr.bf16.mxu1 (!%p140_p2), %v615_v2  ;;  %v598_v18 = vld [vmem:[%s716_s1 + $0x30] sm:$0xff] (!%p140_p2)   ;;  %v600_v19 = vld [vmem:[%s716_s1 + $0x78] sm:$0xff] (!%p140_p2)   ;;  %v512_v28 = vld [vmem:[%s717_s2] ss:$0 sm:$0xff] (!%p140_p2) }
   0xb   : > { %544 = vmatpush3.bf16.msra.mxu0 (!%p140_p2), %v588_v4  ;;  %v601_v20 = vld [vmem:[%s716_s1 + $0x38] sm:$0xff] (!%p140_p2)  }
   0xc   : > { %545 = vmatprep.subr.bf16.mxu0 (!%p140_p2), %v589_v5 }
   0xd   : > { %s720_s18 = smov (!%p165_p3, %s508_s18), 3  ;;  %569 = vmatpush3.bf16.msra.mxu1 %v605_v15 }
   0xe   : > { %s574_s4 = smul.u32 12, %s720_s18  ;;  %s511_s5 = sshll.u32 %s720_s18, 2 }
   0xf   : > { %546 = vmatpush3.bf16.msra.mxu0 %v590_v6  ;;  %s175_s8 = scalar_lea.vmem %s718_s3, %s511_s5 }
  0x10   : > { %547 = vmatprep.subr.bf16.mxu0 %v591_v7  ;;  %s169_s14 = scalar_lea.vmem %s715_s0, %s574_s4 }
  0x11   : > { %v604_v14 = vld [vmem:[%s169_s14 + $0x4] ss:$12 sps:$4 sm:$0xff]   ;;  %v606_v17 = vld [vmem:[%s169_s14 + $0x8] ss:$12 sps:$4 sm:$0xff]   ;;  %v602_v21 = vld [vmem:[%s169_s14] ss:$12 sps:$4 sm:$0xff]  }
  0x12   : > { %384 = vmatprep.mubr.bf16.mxu0 %v604_v14  ;;  %571 = vmatmul.mubr.msk.bf16.vlgmr.msra.gmra.mrb[0].mxu1 %vm348_vm1, %v606_v17 }
  0x13   : > { %548 = vmatpush3.bf16.msra.mxu0 %v592_v8 }
  0x14   : > { %549 = vmatprep.subr.bf16.mxu0 %v593_v9 }
  0x17   : > { %550 = vmatpush3.bf16.msra.mxu0 %v594_v11 }
  0x18   : > { %551 = vmatprep.subr.bf16.mxu0 %v595_v12 }
  0x1b   : > { %552 = vmatpush3.bf16.msra.mxu0 %v596_v13 }
  0x1c   : > { %553 = vmatprep.subr.bf16.mxu0 %v597_v16 }
  0x1f   : > { %554 = vmatpush3.bf16.msra.mxu0 %v598_v18 }
  0x20   : > { %555 = vmatprep.subr.bf16.mxu0 %v600_v19 }
  0x23   : > { %556 = vmatpush3.bf16.msra.mxu0 %v601_v20 }
  0x26   : > { %385 = vmatmul.mubr.bf16.vlgmr.msra.gmra.mrb[0].mxu0 %v602_v21 }
  0xe5   : > { %v427_v22 = vpop.f32.mrb[0].mxu1 }
  0xe6   : > { %v572_v23 = vpop.f32.mrb[1].mxu1 }
  0xe7   : > { %v430_v24 = vpop.f32.mrb[2].mxu1 }
  0xe8   : > { %v573_v25 = vpop.f32.mrb[3].mxu1 }
  0xf9   : > { %v557_v26 = vpop.f32.mrb[0].mxu0 }
  0xfa   : > { %v558_v27 = vpop.f32.mrb[1].mxu0 }
  0xfb   : > { %v559_v29 = vadd.f32 %v558_v27, %v557_v26  ;;  %v560_v30 = vpop.f32.mrb[2].mxu0 }
  0xfc   : > { %v561_v31 = vpop.f32.mrb[3].mxu0 }
  0xfd   : > { %v387_v32 = vadd.f32 %v559_v29, %v512_v28  ;;  %v562_v33 = vadd.f32 %v561_v31, %v560_v30 }
  0xff   : > { %v428_v34 = vadd.f32 %v427_v22, %v387_v32  ;;  %v390_v35 = vadd.f32 %v562_v33, %v512_v28 }
 0x101   : > { %v434_v36 = vmax.f32 %v428_v34, 0.0  ;;  %v431_v37 = vadd.f32 %v430_v24, %v390_v35 }
 0x103   : > { %v539_v38 = vpack.c.bf16 %v434_v36, %v434_v36  ;;  %v435_v39 = vmax.f32 %v431_v37, 0.0 }
 0x105   : > { %445 = vst.msk [vmem:[%s175_s8] sm:$0xf] %vm444_vm2, %v539_v38  ;;  %v540_v40 = vpack.c.bf16 %v435_v39, %v435_v39 }
 0x107   : > { %446 = vst.msk [vmem:[%s175_s8 + $0x4] sm:$0xf] %vm444_vm2, %v540_v40 }
 0x108 PF: > { %s13_s12 = sadd.s32 1, %s613_s12  }
 0x109   : > { %p10_p4 = scmp.ge.s32.totalorder %s13_s12, 4  }
 0x10b   :  { %12 = sbr.rel (!%p10_p4) target bundleno = 1 (0x1), region = 62 }

// kernel: autoencoder_forward.6
= control target key start
LH: loop header
LB: loop body
LE: loop exit
PB: predicated region body
PF: predicated region fallthrough
CT: control target
= control target key end

     0   :  { %s552_s12 = smov 0   ;;  %s624_s0 = inlined_call_operand.vmem [shape: bf16[32,256], index: 0, kind: input, shape index: {}]   ;;  %s625_s1 = inlined_call_operand.vmem [shape: bf16[256,128], index: 1, kind: input, shape index: {}]   ;;  %s626_s2 = inlined_call_operand.vmem [shape: f32[1,128], index: 2, kind: input, shape index: {}]   ;;  %s627_s3 = inlined_call_operand.vmem [shape: bf16[32,128], index: 3, kind: output, shape index: {}]  }
   0x1 LB: > { %s434_s13 = sadd.s32 4294967295, %s530_s12   ;;  %p438_p0 = scmp.ge.s32.totalorder %s530_s12, 1  ;;  %s530_s12 = sphi %s552_s12, %s13_s12  }
   0x2   : > { %p139_p1 = scmp.lt.s32.totalorder %s530_s12, 3 }
   0x4   : > { %p140_p2 = pnand %p438_p0, %p139_p1 }
   0x5   : > { %v505_v0 = vld [vmem:[%s625_s1 + $0x40] sm:$0xff] (!%p140_p2)   ;;  %s439_s16 = sshll.u32 (!%p140_p2), %s434_s13, 1  ;;  %v507_v2 = vld [vmem:[%s625_s1 + $0x48] sm:$0xff] (!%p140_p2)   ;;  %v509_v4 = vld [vmem:[%s625_s1 + $0x50] sm:$0xff] (!%p140_p2)  }
   0x6   : > { %143 = sbr.rel (%p140_p2) target bundleno = 262 (0x106), region = 32  ;;  %v506_v1 = vld [vmem:[%s625_s1] sm:$0xff] (!%p140_p2)   ;;  %475 = vmatprep.subr.bf16.mxu0 (!%p140_p2), %v505_v0  ;;  %v508_v3 = vld [vmem:[%s625_s1 + $0x8] sm:$0xff] (!%p140_p2)   ;;  %p165_p3 = scmp.lt.s32.totalorder (!%p140_p2), %s439_s16, 3  ;;  %v510_v5 = vld [vmem:[%s625_s1 + $0x10] sm:$0xff] (!%p140_p2)  }
   0x7   : > { %476 = vmatpush3.bf16.msra.mxu0 (!%p140_p2), %v506_v1  ;;  %v511_v6 = vld [vmem:[%s625_s1 + $0x58] sm:$0xff] (!%p140_p2)   ;;  %v513_v8 = vld [vmem:[%s625_s1 + $0x60] sm:$0xff] (!%p140_p2)   ;;  %v515_v10 = vld [vmem:[%s625_s1 + $0x68] sm:$0xff] (!%p140_p2)  }
   0x8   : > { %477 = vmatprep.subr.bf16.mxu0 (!%p140_p2), %v507_v2  ;;  %v512_v7 = vld [vmem:[%s625_s1 + $0x18] sm:$0xff] (!%p140_p2)   ;;  %v514_v9 = vld [vmem:[%s625_s1 + $0x20] sm:$0xff] (!%p140_p2)   ;;  %v516_v12 = vld [vmem:[%s625_s1 + $0x28] sm:$0xff] (!%p140_p2)  }
   0x9   : > { %v517_v13 = vld [vmem:[%s625_s1 + $0x70] sm:$0xff] (!%p140_p2)   ;;  %v519_v15 = vld [vmem:[%s625_s1 + $0x78] sm:$0xff] (!%p140_p2)   ;;  %v444_v19 = vld [vmem:[%s626_s2] ss:$0 sm:$0xff] (!%p140_p2) }
   0xa   : > { %v518_v14 = vld [vmem:[%s625_s1 + $0x30] sm:$0xff] (!%p140_p2)   ;;  %v520_v16 = vld [vmem:[%s625_s1 + $0x38] sm:$0xff] (!%p140_p2)  }
   0xb   : > { %478 = vmatpush3.bf16.msra.mxu0 (!%p140_p2), %v508_v3 }
   0xc   : > { %479 = vmatprep.subr.bf16.mxu0 (!%p140_p2), %v509_v4 }
   0xd   : > { %s629_s16 = smov (!%p165_p3, %s439_s16), 3 }
   0xe   : > { %s467_s4 = sshll.u32 %s629_s16, 3  ;;  %s443_s28 = sshll.u32 %s629_s16, 2 }
   0xf   : > { %480 = vmatpush3.bf16.msra.mxu0 %v510_v5  ;;  %s169_s9 = scalar_lea.vmem %s624_s0, %s467_s4  ;;  %s175_s4 = scalar_lea.vmem %s627_s3, %s443_s28 }
  0x10   : > { %481 = vmatprep.subr.bf16.mxu0 %v511_v6  ;;  %v523_v11 = vld [vmem:[%s169_s9 + $0x4] ss:$8 sps:$4 sm:$0xff]   ;;  %v521_v17 = vld [vmem:[%s169_s9] ss:$8 sps:$4 sm:$0xff]  }
  0x11   : > { %357 = vmatprep.mubr.bf16.mxu0 %v523_v11 }
  0x13   : > { %482 = vmatpush3.bf16.msra.mxu0 %v512_v7 }
  0x14   : > { %483 = vmatprep.subr.bf16.mxu0 %v513_v8 }
  0x17   : > { %484 = vmatpush3.bf16.msra.mxu0 %v514_v9 }
  0x18   : > { %485 = vmatprep.subr.bf16.mxu0 %v515_v10 }
  0x1b   : > { %486 = vmatpush3.bf16.msra.mxu0 %v516_v12 }
  0x1c   : > { %487 = vmatprep.subr.bf16.mxu0 %v517_v13 }
  0x1f   : > { %488 = vmatpush3.bf16.msra.mxu0 %v518_v14 }
  0x20   : > { %489 = vmatprep.subr.bf16.mxu0 %v519_v15 }
  0x23   : > { %490 = vmatpush3.bf16.msra.mxu0 %v520_v16 }
  0x26   : > { %358 = vmatmul.mubr.bf16.vlgmr.msra.gmra.mrb[0].mxu0 %v521_v17 }
  0xf9   : > { %v491_v18 = vpop.f32.mrb[0].mxu0 }
  0xfa   : > { %v492_v20 = vpop.f32.mrb[1].mxu0 }
  0xfb   : > { %v493_v21 = vadd.f32 %v492_v20, %v491_v18  ;;  %v494_v22 = vpop.f32.mrb[2].mxu0 }
  0xfc   : > { %v495_v23 = vpop.f32.mrb[3].mxu0 }
  0xfd   : > { %v360_v24 = vadd.f32 %v493_v21, %v444_v19  ;;  %v496_v25 = vadd.f32 %v495_v23, %v494_v22 }
  0xff   : > { %v363_v26 = vadd.f32 %v496_v25, %v444_v19  ;;  %v366_v27 = vmax.f32 %v360_v24, 0.0 }
 0x101   : > { %v367_v28 = vmax.f32 %v363_v26, 0.0 }
 0x103   : > { %v473_v29 = vpack.c.bf16 %v367_v28, %v366_v27 }
 0x105   : > { %474 = vst [vmem:[%s175_s4] sm:$0xff] %v473_v29  }
 0x106 PF: > { %s13_s12 = sadd.s32 1, %s530_s12  }
 0x107   : > { %p10_p4 = scmp.ge.s32.totalorder %s13_s12, 4  }
 0x109   :  { %12 = sbr.rel (!%p10_p4) target bundleno = 1 (0x1), region = 62 }

// kernel: tile.18
= control target key start
LH: loop header
LB: loop body
LE: loop exit
PB: predicated region body
PF: predicated region fallthrough
CT: control target
= control target key end

     0   :  { %s22_s0 = inlined_call_operand.vmem [shape: f32[3], index: 0, kind: input, shape index: {}]   ;;  %s23_s1 = inlined_call_operand.vmem [shape: f32[4,3], index: 1, kind: output, shape index: {}]  }
   0x1   :  { %v4_v0 = vld [vmem:[%s22_s0] ss:$0 sm:$0xff] }
   0x2   :  { %5 = vst [vmem:[%s23_s1] sm:$0xf] %v4_v0 }

// kernel: tile.19
= control target key start
LH: loop header
LB: loop body
LE: loop exit
PB: predicated region body
PF: predicated region fallthrough
CT: control target
= control target key end

     0   :  { %vm7_vm0 = vcmask 23552   ;;  %s37_s8 = smov 3   ;;  %s38_s9 = smov 6   ;;  %vm13_vm1 = vcmask 97352   ;;  %vm19_vm2 = vcmask 72752   ;;  %vm25_vm3 = vcmask 48152   ;;  %s55_s0 = inlined_call_operand.vmem [shape: f32[4,3], index: 0, kind: input, shape index: {}]   ;;  %s56_s1 = inlined_call_operand.vmem [shape: f32[1,12], index: 1, kind: output, shape index: {}]  }
   0x1   :  { %v4_v0 = vld [vmem:[%s55_s0] sm:$0xf]  ;;  %s36_s0 = smov 9  }
   0x2   :  { %5 = vst [vmem:[#allocation1] sm:$0xf] %v4_v0 }
   0x9   :  { %v10_v1 = vld [vmem:[#allocation1 + $0x3] sm:$0x1]   ;;  %v22_v2 = vld [vmem:[#allocation1 + $0x1] sm:$0x1]   ;;  %v6_v3 = vld [vmem:[#allocation1] sm:$0x1]  }
   0xa   :  { %11 = vrot.lane.b32.xlu0 %v10_v1, %s36_s0  ;;  %23 = vrot.lane.b32.xlu1 %v22_v2, %s37_s8  ;;  %v16_v4 = vld [vmem:[#allocation1 + $0x2] sm:$0x1]   ;;  %8 = vst.msk [vmem:[#allocation0] sm:$0x1] %vm7_vm0, %v6_v3  }
   0xe   :  { %17 = vrot.lane.b32.xlu0 %v16_v4, %s38_s9 }
  0x7c   :  { %v12_v5 = vpop.permute.xlu0 %11   ;;  %v24_v6 = vpop.permute.xlu1 %23  }
  0x7d   :  { %14 = vst.msk [vmem:[#allocation0] sm:$0x1] %vm13_vm1, %v12_v5  }
  0x80   :  { %v18_v7 = vpop.permute.xlu0 %17  }
  0x81   :  { %20 = vst.msk [vmem:[#allocation0] sm:$0x1] %vm19_vm2, %v18_v7  }
  0x82   :  { %26 = vst.msk [vmem:[#allocation0] sm:$0x1] %vm25_vm3, %v24_v6  }
  0x89   :  { %v30_v8 = vld [vmem:[#allocation0] sm:$0x1] }
  0x8a   :  { %32 = vst [vmem:[%s56_s1] sm:$0x1] %v30_v8 }

// kernel: autoencoder_forward.7
= control target key start
LH: loop header
LB: loop body
LE: loop exit
PB: predicated region body
PF: predicated region fallthrough
CT: control target
= control target key end

     0   :  { %s636_s12 = smov 0   ;;  %s740_s0 = inlined_call_operand.vmem [shape: bf16[128,128], index: 0, kind: input, shape index: {}]   ;;  %s741_s1 = inlined_call_operand.vmem [shape: bf16[128,12], index: 1, kind: input, shape index: {}]   ;;  %s742_s2 = inlined_call_operand.vmem [shape: f32[1,12], index: 2, kind: input, shape index: {}]   ;;  %s743_s3 = inlined_call_operand.vmem [shape: f32[128,12], index: 3, kind: output, shape index: {}]  }
   0x1 LB: > { %s480_s13 = sadd.s32 4294967295, %s614_s12   ;;  %p484_p0 = scmp.ge.s32.totalorder %s614_s12, 1  ;;  %s614_s12 = sphi %s636_s12, %s13_s12  }
   0x2   : > { %p138_p1 = scmp.lt.s32.totalorder %s614_s12, 3 }
   0x4   : > { %p139_p2 = pnand %p484_p0, %p138_p1 }
   0x5   : > { %v564_v0 = vld [vmem:[%s741_s1] sm:$0xff] (!%p139_p2)   ;;  %s485_s16 = sshll.u32 (!%p139_p2), %s480_s13, 3  ;;  %v565_v1 = vld [vmem:[%s741_s1 + $0x8] sm:$0xff] (!%p139_p2)   ;;  %v566_v2 = vld [vmem:[%s741_s1 + $0x10] sm:$0xff] (!%p139_p2)   ;;  %vm415_vm1 = vcmask (!%p139_p2), 97280  }
   0x6   : > { %142 = sbr.rel (%p139_p2) target bundleno = 292 (0x124), region = 32  ;;  %p163_p3 = scmp.lt.s32.totalorder (!%p139_p2), %s485_s16, 15  ;;  %516 = vmatprep.subr.bf16.mxu0 (!%p139_p2), %v564_v0  ;;  %540 = vmatprep.subr.bf16.mxu1 (!%p139_p2), %v564_v0  ;;  %v567_v3 = vld [vmem:[%s741_s1 + $0x18] sm:$0xff] (!%p139_p2)   ;;  %v568_v6 = vld [vmem:[%s741_s1 + $0x20] sm:$0xff] (!%p139_p2)   ;;  %v569_v7 = vld [vmem:[%s741_s1 + $0x28] sm:$0xff] (!%p139_p2)  }
   0x7   : > { %517 = vmatpush3.bf16.msra.mxu0 (!%p139_p2), %v564_v0  ;;  %548 = vmatpush3.bf16.msra.mxu1 (!%p139_p2), %v564_v0  ;;  %v570_v8 = vld [vmem:[%s741_s1 + $0x30] sm:$0xff] (!%p139_p2)   ;;  %v571_v9 = vld [vmem:[%s741_s1 + $0x38] sm:$0xff] (!%p139_p2)   ;;  %v489_v12 = vld [vmem:[%s742_s2] ss:$0 sm:$0xff] (!%p139_p2) }
   0x8   : > { %518 = vmatprep.subr.bf16.mxu0 (!%p139_p2), %v565_v1  ;;  %541 = vmatprep.subr.bf16.mxu1 (!%p139_p2), %v565_v1 }
   0xb   : > { %519 = vmatpush3.bf16.msra.mxu0 (!%p139_p2), %v565_v1  ;;  %549 = vmatpush3.bf16.msra.mxu1 (!%p139_p2), %v565_v1 }
   0xc   : > { %520 = vmatprep.subr.bf16.mxu0 (!%p139_p2), %v566_v2  ;;  %542 = vmatprep.subr.bf16.mxu1 (!%p139_p2), %v566_v2 }
   0xd   : > { %s745_s16 = smov (!%p163_p3, %s485_s16), 15 }
   0xe   : > { %s486_s21 = sshll.u32 %s745_s16, 2  ;;  %s488_s10 = sshll.u32 %s745_s16, 3 }
   0xf   : > { %s659_s24 = scalar_lea.vmem %s740_s0, %s486_s21  ;;  %521 = vmatpush3.bf16.msra.mxu0 %v566_v2  ;;  %550 = vmatpush3.bf16.msra.mxu1 %v566_v2  ;;  %s712_s14 = scalar_lea.vmem %s743_s3, %s488_s10 }
  0x10   : > { %v572_v4 = vld [vmem:[%s659_s24] sm:$0xff]   ;;  %v573_v5 = vld [vmem:[%s659_s24 + $0x10] sm:$0xff]   ;;  %522 = vmatprep.subr.bf16.mxu0 %v567_v3  ;;  %543 = vmatprep.subr.bf16.mxu1 %v567_v3  ;;  %v574_v10 = vld [vmem:[%s659_s24 + $0x8] sm:$0xff]  }
  0x11   : > { %532 = vmatprep.mubr.bf16.mxu0 %v572_v4  ;;  %536 = vmatprep.mubr.bf16.mxu1 %v573_v5  ;;  %v575_v11 = vld [vmem:[%s659_s24 + $0x18] sm:$0xff]  }
  0x13   : > { %523 = vmatpush3.bf16.msra.mxu0 %v567_v3  ;;  %551 = vmatpush3.bf16.msra.mxu1 %v567_v3 }
  0x14   : > { %524 = vmatprep.subr.bf16.mxu0 %v568_v6  ;;  %544 = vmatprep.subr.bf16.mxu1 %v568_v6 }
  0x17   : > { %525 = vmatpush3.bf16.msra.mxu0 %v568_v6  ;;  %552 = vmatpush3.bf16.msra.mxu1 %v568_v6 }
  0x18   : > { %526 = vmatprep.subr.bf16.mxu0 %v569_v7  ;;  %545 = vmatprep.subr.bf16.mxu1 %v569_v7 }
  0x1b   : > { %527 = vmatpush3.bf16.msra.mxu0 %v569_v7  ;;  %553 = vmatpush3.bf16.msra.mxu1 %v569_v7 }
  0x1c   : > { %528 = vmatprep.subr.bf16.mxu0 %v570_v8  ;;  %546 = vmatprep.subr.bf16.mxu1 %v570_v8 }
  0x1f   : > { %529 = vmatpush3.bf16.msra.mxu0 %v570_v8  ;;  %554 = vmatpush3.bf16.msra.mxu1 %v570_v8 }
  0x20   : > { %530 = vmatprep.subr.bf16.mxu0 %v571_v9  ;;  %547 = vmatprep.subr.bf16.mxu1 %v571_v9 }
  0x23   : > { %531 = vmatpush3.bf16.msra.mxu0 %v571_v9  ;;  %555 = vmatpush3.bf16.msra.mxu1 %v571_v9 }
  0x26   : > { %533 = vmatmul.mubr.bf16.vlgmr.msra.gmra.mrb[0].mxu0 %v574_v10  ;;  %537 = vmatmul.mubr.bf16.vlgmr.msra.gmra.mrb[0].mxu1 %v575_v11 }
  0xf9   : > { %v534_v13 = vpop.f32.mrb[0].mxu0  ;;  %v538_v14 = vpop.f32.mrb[0].mxu1 }
  0xfa   : > { %v683_v15 = vadd.f32 %v534_v13, %v489_v12  ;;  %v685_v16 = vadd.f32 %v538_v14, %v489_v12  ;;  %v312_v17 = vpop.f32.mrb[1].mxu0  ;;  %v328_v18 = vpop.f32.mrb[1].mxu1 }
  0xfb   : > { %v687_v19 = vadd.f32 %v489_v12, %v312_v17  ;;  %v689_v20 = vadd.f32 %v489_v12, %v328_v18  ;;  %v535_v21 = vpop.f32.mrb[2].mxu0  ;;  %v539_v22 = vpop.f32.mrb[2].mxu1 }
  0xfc   : > { %v345_v23 = vand.u32 2147483647, %v683_v15  ;;  %v349_v24 = vand.u32 2147483647, %v685_v16  ;;  %v695_v29 = vadd.f32 %v535_v21, %v489_v12  ;;  %v697_v30 = vadd.f32 %v539_v22, %v489_v12  ;;  %v315_v31 = vpop.f32.mrb[3].mxu0  ;;  %v331_v32 = vpop.f32.mrb[3].mxu1 }
  0xfd   : > { %v343_v25 = vand.u32 2147483647, %v687_v19  ;;  %v347_v26 = vand.u32 2147483647, %v689_v20  ;;  %v699_v35 = vadd.f32 %v489_v12, %v315_v31  ;;  %v701_v36 = vadd.f32 %v489_v12, %v331_v32 }
  0xfe   : > { %v353_v27 = vsub.f32 0.0, %v345_v23  ;;  %v357_v28 = vsub.f32 0.0, %v349_v24  ;;  %v346_v39 = vand.u32 2147483647, %v695_v29  ;;  %v350_v43 = vand.u32 2147483647, %v697_v30 }
  0xff   : > { %v351_v33 = vsub.f32 0.0, %v343_v25  ;;  %v355_v34 = vsub.f32 0.0, %v347_v26  ;;  %v344_v44 = vand.u32 2147483647, %v699_v35  ;;  %v348_v45 = vand.u32 2147483647, %v701_v36 }
 0x100   : > { %v363_v37 = vmul.f32 1.442695, %v353_v27  ;;  %v371_v38 = vmul.f32 1.442695, %v357_v28  ;;  %v354_v42 = vsub.f32 0.0, %v346_v39  ;;  %v358_v47 = vsub.f32 0.0, %v350_v43 }
 0x101   : > { %v359_v40 = vmul.f32 1.442695, %v351_v33  ;;  %v367_v41 = vmul.f32 1.442695, %v355_v34  ;;  %v352_v48 = vsub.f32 0.0, %v344_v44  ;;  %v356_v49 = vsub.f32 0.0, %v348_v45 }
 0x102   : > { %576 = vpow2.f32 %v363_v37  ;;  %v365_v46 = vmul.f32 1.442695, %v354_v42  ;;  %v373_v50 = vmul.f32 1.442695, %v358_v47  ;;  %vm377_vm0 = vcmp.ge.f32.partialorder %v683_v15, 0.0 }
 0x103   : > { %578 = vpow2.f32 %v371_v38  ;;  %v361_v51 = vmul.f32 1.442695, %v352_v48  ;;  %v369_v52 = vmul.f32 1.442695, %v356_v49  ;;  %vm381_vm2 = vcmp.ge.f32.partialorder %v685_v16, 0.0 }
 0x104   : > { %580 = vpow2.f32 %v359_v40  ;;  %vm375_vm3 = vcmp.ge.f32.partialorder %v687_v19, 0.0  ;;  %vm379_vm4 = vcmp.ge.f32.partialorder %v689_v20, 0.0  ;;  %vm378_vm5 = vcmp.ge.f32.partialorder %v695_v29, 0.0 }
 0x105   : > { %582 = vpow2.f32 %v367_v41  ;;  %vm382_vm6 = vcmp.ge.f32.partialorder %v697_v30, 0.0  ;;  %vm376_vm7 = vcmp.ge.f32.partialorder %v699_v35, 0.0  ;;  %vm380_vm8 = vcmp.ge.f32.partialorder %v701_v36, 0.0 }
 0x106   : > { %584 = vpow2.f32 %v365_v46 }
 0x107   : > { %586 = vpow2.f32 %v373_v50 }
 0x108   : > { %588 = vpow2.f32 %v361_v51 }
 0x109   : > { %590 = vpow2.f32 %v369_v52 }
 0x10c   : > { %v577_v53 = vpop.eup %576 }
 0x10d   : > { %v579_v54 = vpop.eup %578  ;;  %v393_v55 = vadd.f32 1.0, %v577_v53  ;;  %v385_v6 = vsel %vm377_vm0, 1.0, %v577_v53 }
 0x10e   : > { %v581_v56 = vpop.eup %580  ;;  %v397_v57 = vadd.f32 1.0, %v579_v54  ;;  %v389_v9 = vsel %vm381_vm2, 1.0, %v579_v54 }
 0x10f   : > { %v583_v58 = vpop.eup %582  ;;  %592 = vrcp.f32 %v393_v55  ;;  %v391_v59 = vadd.f32 1.0, %v581_v56  ;;  %v383_v12 = vsel %vm375_vm3, 1.0, %v581_v56 }
 0x110   : > { %v585_v60 = vpop.eup %584  ;;  %594 = vrcp.f32 %v397_v57  ;;  %v395_v61 = vadd.f32 1.0, %v583_v58  ;;  %v387_v15 = vsel %vm379_vm4, 1.0, %v583_v58 }
 0x111   : > { %596 = vrcp.f32 %v391_v59  ;;  %v394_v62 = vadd.f32 1.0, %v585_v60  ;;  %v587_v63 = vpop.eup %586  ;;  %v386_v18 = vsel %vm378_vm5, 1.0, %v585_v60 }
 0x112   : > { %598 = vrcp.f32 %v395_v61  ;;  %v589_v0 = vpop.eup %588  ;;  %v398_v1 = vadd.f32 1.0, %v587_v63  ;;  %v390_v21 = vsel %vm382_vm6, 1.0, %v587_v63 }
 0x113   : > { %600 = vrcp.f32 %v394_v62  ;;  %v591_v2 = vpop.eup %590  ;;  %v392_v3 = vadd.f32 1.0, %v589_v0  ;;  %v384_v24 = vsel %vm376_vm7, 1.0, %v589_v0 }
 0x114   : > { %602 = vrcp.f32 %v398_v1  ;;  %v396_v4 = vadd.f32 1.0, %v591_v2  ;;  %v388_v27 = vsel %vm380_vm8, 1.0, %v591_v2 }
 0x115   : > { %604 = vrcp.f32 %v392_v3 }
 0x116   : > { %606 = vrcp.f32 %v396_v4 }
 0x119   : > { %v593_v5 = vpop.eup %592 }
 0x11a   : > { %v595_v7 = vpop.eup %594  ;;  %v409_v8 = vmul.f32 %v593_v5, %v385_v6 }
 0x11b   : > { %v597_v10 = vpop.eup %596  ;;  %v413_v11 = vmul.f32 %v595_v7, %v389_v9 }
 0x11c   : > { %v599_v13 = vpop.eup %598  ;;  %418 = vst.msk [vmem:[%s712_s14 + $0x10] sm:$0xff] %vm415_vm1, %v409_v8  ;;  %v407_v14 = vmul.f32 %v597_v10, %v383_v12 }
 0x11d   : > { %v601_v16 = vpop.eup %600  ;;  %422 = vst.msk [vmem:[%s712_s14 + $0x30] sm:$0xff] %vm415_vm1, %v413_v11  ;;  %v411_v17 = vmul.f32 %v599_v13, %v387_v15 }
 0x11e   : > { %416 = vst.msk [vmem:[%s712_s14] sm:$0xff] %vm415_vm1, %v407_v14  ;;  %v410_v19 = vmul.f32 %v601_v16, %v386_v18  ;;  %v603_v20 = vpop.eup %602 }
 0x11f   : > { %420 = vst.msk [vmem:[%s712_s14 + $0x20] sm:$0xff] %vm415_vm1, %v411_v17  ;;  %v605_v22 = vpop.eup %604  ;;  %v414_v23 = vmul.f32 %v603_v20, %v390_v21 }
 0x120   : > { %419 = vst.msk [vmem:[%s712_s14 + $0x18] sm:$0xff] %vm415_vm1, %v410_v19  ;;  %v607_v25 = vpop.eup %606  ;;  %v408_v26 = vmul.f32 %v605_v22, %v384_v24 }
 0x121   : > { %423 = vst.msk [vmem:[%s712_s14 + $0x38] sm:$0xff] %vm415_vm1, %v414_v23  ;;  %v412_v28 = vmul.f32 %v607_v25, %v388_v27 }
 0x122   : > { %417 = vst.msk [vmem:[%s712_s14 + $0x8] sm:$0xff] %vm415_vm1, %v408_v26 }
 0x123   : > { %421 = vst.msk [vmem:[%s712_s14 + $0x28] sm:$0xff] %vm415_vm1, %v412_v28 }
 0x124 PF: > { %s13_s12 = sadd.s32 1, %s614_s12  }
 0x125   : > { %p10_p4 = scmp.ge.s32.totalorder %s13_s12, 4  }
 0x127   :  { %12 = sbr.rel (!%p10_p4) target bundleno = 1 (0x1), region = 62 }

</bundles_post_ra>
